<compile_context>
chip_gen: v5e
topology: v5e:2x2
jax: 0.10.0
libtpu: 0.0.40
codegen_flags: <defaults>
</compile_context>

<pallas_src>
import jax
import jax.numpy as jnp
from jax.experimental import pallas as pl
from jax.experimental.pallas import tpu as pltpu


def _round_up(x: int, m: int) -> int:
    return -(-x // m) * m


# --------------------------------------------------------------------------
# Kernel
# --------------------------------------------------------------------------
def _make_kernel(n_rest: int, n_distr: int, stacked: bool):
    """Feature-major kernel.  Ref order:
       xT, w0T, b0T, [rest_wT, rest_bT] or (wT_i, bT_i)*, w_headT, b_headT, out."""

    def kernel(*refs):
        out_ref = refs[-1]
        xT = refs[0][...]                                   # [n_in, TB] f32
        w0T = refs[1][...]                                   # [h0, n_in] bf16
        b0T = refs[2][...]                                   # [h0, 1]    f32

        # trunk layer 0: h^T = tanh(W0^T @ x^T + b0) ; single K=n_in MXU pass
        h = jnp.tanh(
            jnp.dot(w0T, xT.astype(jnp.bfloat16),
                    preferred_element_type=jnp.float32) + b0T)

        idx = 3
        if stacked and n_rest > 0:
            w_st, b_st = refs[idx], refs[idx + 1]            # [L-1,h,h] bf16 / [L-1,h,1] f32
            idx += 2
            for l in range(n_rest):
                h = jnp.tanh(
                    jnp.dot(w_st[l], h.astype(jnp.bfloat16),
                            preferred_element_type=jnp.float32) + b_st[l])
        else:
            for _ in range(n_rest):
                w, b = refs[idx][...], refs[idx + 1][...]
                idx += 2
                h = jnp.tanh(
                    jnp.dot(w, h.astype(jnp.bfloat16),
                            preferred_element_type=jnp.float32) + b)

        # fused mu|sigma head: rows [0, n_distr) = mu, rows [n_distr, 2*n_distr) = sigma
        w_head = refs[idx][...]                              # [2*nd, h] bf16
        b_head = refs[idx + 1][...]                          # [2*nd, 1] f32
        z = jnp.dot(w_head, h.astype(jnp.bfloat16),
                    preferred_element_type=jnp.float32) + b_head

        # PyTorch Softplus (beta=1, threshold=20) on the sigma rows only.  With a
        # small head (2*n_distr <= 8 rows) the whole [2*nd, 128] tile is one vreg,
        # so a per-row select costs the same as a sublane slice would.
        # Note: for very negative logits log1p(exp(z)) underflows to 0.0 exactly,
        # matching PyTorch's softplus.
        z_safe = jnp.where(z > 20.0, 0.0, z)                 # avoid exp overflow
        sp = jnp.where(z > 20.0, z, jnp.log1p(jnp.exp(z_safe)))
        row = jax.lax.broadcasted_iota(jnp.int32, z.shape, 0)
        out_ref[...] = jnp.where(row >= n_distr, sp, z)      # [2*nd, TB], lane-dense

    return kernel


# --------------------------------------------------------------------------
# Parameter packing (done once) + forward wrapper
# --------------------------------------------------------------------------
def prepare_params(params):
    """Pre-transpose weights (feature-major), fuse mu/sigma head, stack the
    equal-shaped trunk layers, cast matmul weights to bf16.  Only arrays (or
    None / empty lists) are stored, so the dict jits cleanly as a pytree."""
    trunk = params["trunk"]
    w0, b0 = trunk[0]
    rest = trunk[1:]
    w_mu, b_mu = params["mu"]
    w_sig, b_sig = params["sigma"]

    packed = {
        "w0T": w0.T.astype(jnp.bfloat16),                            # [h0, n_in]
        "b0T": b0.reshape(-1, 1),                                    # [h0, 1] f32
        "w_headT": jnp.concatenate([w_mu, w_sig], 1).T.astype(jnp.bfloat16),  # [2*nd, h]
        "b_headT": jnp.concatenate([b_mu, b_sig], 1).reshape(-1, 1),          # [2*nd, 1] f32
    }
    if rest and all(w.shape == rest[0][0].shape for w, _ in rest):
        packed["rest_wT"] = jnp.stack([w.T.astype(jnp.bfloat16) for w, _ in rest])
        packed["rest_bT"] = jnp.stack([b.reshape(-1, 1) for _, b in rest])
        packed["rest_sep"] = []
    else:
        packed["rest_wT"] = None
        packed["rest_bT"] = None
        packed["rest_sep"] = [(w.T.astype(jnp.bfloat16), b.reshape(-1, 1))
                              for w, b in rest]
    return packed


def ffn_params_normal_forward(packed, *args, block_batch=None):
    """args: each [B, d_i] float32.  Returns (mu, sigma), each [B, n_distr] f32."""
    batch = args[0].shape[0]
    # One fused transpose+concat pass in the wrapper (feature-major input).
    xT = jnp.concatenate(args, axis=-1).T                    # [n_in, B]
    n_in = xT.shape[0]
    two_nd = packed["w_headT"].shape[0]                      # static (shape), jit-safe
    n_distr = two_nd // 2

    stacked = packed["rest_wT"] is not None
    n_rest = packed["rest_wT"].shape[0] if stacked else len(packed["rest_sep"])

    # Batch tile on the lane axis: multiples of 128, large cap (VMEM use at TB=4096
    # is < ~2 MiB of activations, far below any generation's limit).
    if block_batch is None:
        cap = 4096                                           # sweep 2048..8192
        tb = min(_round_up(batch, 128), cap)
        if batch >= 256 and pl.cdiv(batch, tb) < 2:
            # Keep >= 2 grid steps so the parallel axis spans both v7x TensorCores.
            tb = _round_up(pl.cdiv(batch, 2), 128)
    else:
        tb = _round_up(int(block_batch), 128)
    grid = (pl.cdiv(batch, tb),)                             # no jnp.pad: ragged tail OK

    operands = [xT]
    in_specs = [pl.BlockSpec((n_in, tb), lambda i: (0, i))]

    def add_resident(arr):
        # Constant index_map -> block stays VMEM-resident across grid steps.
        operands.append(arr)
        in_specs.append(pl.BlockSpec(arr.shape, lambda i, _nd=arr.ndim: (0,) * _nd))

    add_resident(packed["w0T"])
    add_resident(packed["b0T"])
    if stacked:
        add_resident(packed["rest_wT"])
        add_resident(packed["rest_bT"])
    else:
        for w, b in packed["rest_sep"]:
            add_resident(w)
            add_resident(b)
    add_resident(packed["w_headT"])
    add_resident(packed["b_headT"])

    out = pl.pallas_call(
        _make_kernel(n_rest, n_distr, stacked),
        out_shape=jax.ShapeDtypeStruct((two_nd, batch), jnp.float32),
        grid=grid,
        in_specs=in_specs,
        out_specs=pl.BlockSpec((two_nd, tb), lambda i: (0, i)),
        compiler_params=pltpu.CompilerParams(
            dimension_semantics=("parallel",)),
    )(*operands)

    # Split fused head and transpose back to batch-major.
    return out[:n_distr, :].T, out[n_distr:, :].T


# --------------------------------------------------------------------------
# Deterministic init + references
# --------------------------------------------------------------------------
def init_params(key, n_in, n_distr, hidden_sizes):
    """Mimics nn.Linear default init U(-1/sqrt(fan_in), 1/sqrt(fan_in))."""
    def linear(key, fan_in, fan_out):
        kw, kb = jax.random.split(key)
        bound = 1.0 / jnp.sqrt(fan_in)
        w = jax.random.uniform(kw, (fan_in, fan_out), jnp.float32, -bound, bound)
        b = jax.random.uniform(kb, (1, fan_out), jnp.float32, -bound, bound)
        return w, b

    sizes = [n_in] + list(hidden_sizes)
    trunk = []
    for j in range(1, len(sizes)):
        key, k = jax.random.split(key)
        trunk.append(linear(k, sizes[j - 1], sizes[j]))
    key, k_mu, k_sig = jax.random.split(key, 3)
    return {
        "trunk": trunk,
        "mu": linear(k_mu, hidden_sizes[-1], n_distr),
        "sigma": linear(k_sig, hidden_sizes[-1], n_distr),
    }


def reference_forward_f32(x, params):
    """Pure-f32 JAX reference matching the PyTorch module."""
    h = x
    for w, b in params["trunk"]:
        h = jnp.tanh(h @ w + b)
    w_mu, b_mu = params["mu"]
    w_sig, b_sig = params["sigma"]
    mu = h @ w_mu + b_mu
    z = h @ w_sig + b_sig
    sigma = jnp.where(z > 20.0, z, jnp.log1p(jnp.exp(jnp.where(z > 20.0, 0.0, z))))
    return mu, sigma


def reference_forward_bf16(x, params):
    """Same arithmetic recipe as the kernel (bf16 matmul operands, f32 elsewhere)."""
    def bdot(a, w):
        return jnp.dot(a.astype(jnp.bfloat16), w.astype(jnp.bfloat16),
                       preferred_element_type=jnp.float32)
    h = x
    for w, b in params["trunk"]:
        h = jnp.tanh(bdot(h, w) + b)
    w_mu, b_mu = params["mu"]
    w_sig, b_sig = params["sigma"]
    mu = bdot(h, w_mu) + b_mu
    z = bdot(h, w_sig) + b_sig
    sigma = jnp.where(z > 20.0, z, jnp.log1p(jnp.exp(jnp.where(z > 20.0, 0.0, z))))
    return mu, sigma


# --------------------------------------------------------------------------
# Demo / self-check
# --------------------------------------------------------------------------
if __name__ == "__main__":
    batch = 8
    n_distr = 4
    hidden_sizes = [32, 32]
    arg_widths = (5, 3)                 # forward(*args) concatenates these
    n_in = sum(arg_widths)

    key = jax.random.PRNGKey(0)
    key, k_params, k_a, k_b = jax.random.split(key, 4)

    params = init_params(k_params, n_in, n_distr, hidden_sizes)
    packed = prepare_params(params)

    arg0 = jax.random.normal(k_a, (batch, arg_widths[0]), jnp.float32)
    arg1 = jax.random.normal(k_b, (batch, arg_widths[1]), jnp.float32)

    fwd = jax.jit(ffn_params_normal_forward)
    mu, sigma = fwd(packed, arg0, arg1)
    jax.block_until_ready((mu, sigma))

    x = jnp.concatenate([arg0, arg1], axis=-1)
    mu_f32, sigma_f32 = reference_forward_f32(x, params)
    mu_b16, sigma_b16 = reference_forward_bf16(x, params)

    assert mu.shape == (batch, n_distr) and sigma.shape == (batch, n_distr)
    # Tight parity vs. a reference using the same bf16-matmul recipe.
    assert jnp.allclose(mu, mu_b16, atol=2e-3, rtol=2e-3)
    assert jnp.allclose(sigma, sigma_b16, atol=2e-3, rtol=2e-3)
    # Loose parity vs. the pure-f32 PyTorch-equivalent math (bf16 MXU inputs).
    assert jnp.allclose(mu, mu_f32, atol=5e-2, rtol=5e-2)
    assert jnp.allclose(sigma, sigma_f32, atol=5e-2, rtol=5e-2)
    # Softplus of O(1) logits is comfortably positive at these magnitudes.
    assert bool(jnp.all(sigma > 0.0))

    print("KERNEL_OK")
</pallas_src>

<mosaic_0001>
module attributes {stable_mosaic.version = 11 : i64} {
  func.func @kernel(%arg0: i32, %arg1: memref<8x128xf32, #tpu.memory_space<vmem>>, %arg2: memref<32x8xbf16, #tpu.memory_space<vmem>>, %arg3: memref<32x1xf32, #tpu.memory_space<vmem>>, %arg4: memref<1x32x32xbf16, #tpu.memory_space<vmem>>, %arg5: memref<1x32x1xf32, #tpu.memory_space<vmem>>, %arg6: memref<8x32xbf16, #tpu.memory_space<vmem>>, %arg7: memref<8x1xf32, #tpu.memory_space<vmem>>, %arg8: memref<8x128xf32, #tpu.memory_space<vmem>>) attributes {dimension_semantics = [#tpu.dimension_semantics<parallel>], iteration_bounds = array<i64: 1>, scalar_prefetch = 0 : i64, scratch_operands = 0 : i64, tpu.core_type = #tpu.core_type<tc>, window_params = [{transform_indices = @transform_0, window_bounds = array<i64: 8, 128>}, {pipeline_mode = #tpu.pipeline_mode<synchronous>, transform_indices = @transform_1, window_bounds = array<i64: 32, 8>}, {pipeline_mode = #tpu.pipeline_mode<synchronous>, transform_indices = @transform_2, window_bounds = array<i64: 32, 1>}, {pipeline_mode = #tpu.pipeline_mode<synchronous>, transform_indices = @transform_3, window_bounds = array<i64: 1, 32, 32>}, {pipeline_mode = #tpu.pipeline_mode<synchronous>, transform_indices = @transform_4, window_bounds = array<i64: 1, 32, 1>}, {pipeline_mode = #tpu.pipeline_mode<synchronous>, transform_indices = @transform_5, window_bounds = array<i64: 8, 32>}, {pipeline_mode = #tpu.pipeline_mode<synchronous>, transform_indices = @transform_6, window_bounds = array<i64: 8, 1>}, {transform_indices = @transform_7, window_bounds = array<i64: 8, 128>}]} {
    %c0 = arith.constant 0 : index
    %c0_0 = arith.constant 0 : index
    %0 = vector.load %arg1[%c0, %c0_0] : memref<8x128xf32, #tpu.memory_space<vmem>>, vector<8x128xf32>
    %c0_1 = arith.constant 0 : index
    %c0_2 = arith.constant 0 : index
    %1 = vector.load %arg2[%c0_1, %c0_2] : memref<32x8xbf16, #tpu.memory_space<vmem>>, vector<32x8xbf16>
    %c0_3 = arith.constant 0 : index
    %c0_4 = arith.constant 0 : index
    %2 = vector.load %arg3[%c0_3, %c0_4] : memref<32x1xf32, #tpu.memory_space<vmem>>, vector<32x1xf32>
    %3 = arith.truncf %0 : vector<8x128xf32> to vector<8x128xbf16>
    %cst = arith.constant dense<0.000000e+00> : vector<32x128xf32>
    %4 = tpu.matmul %1, %3, %cst {dimension_numbers = #tpu.dot_dimension_numbers<[1], [0], [0], [1], [0, 0, 1, 1], [], []>} : vector<32x8xbf16>, vector<8x128xbf16>, vector<32x128xf32> -> vector<32x128xf32>
    %5 = vector.broadcast %2 : vector<32x1xf32> to vector<32x128xf32>
    %6 = arith.addf %4, %5 : vector<32x128xf32>
    %7 = math.tanh %6 : vector<32x128xf32>
    %c0_5 = arith.constant 0 : index
    %c0_6 = arith.constant 0 : index
    %c0_7 = arith.constant 0 : index
    %8 = vector.load %arg4[%c0_5, %c0_6, %c0_7] : memref<1x32x32xbf16, #tpu.memory_space<vmem>>, vector<1x32x32xbf16>
    %9 = vector.shape_cast %8 : vector<1x32x32xbf16> to vector<32x32xbf16>
    %10 = arith.truncf %7 : vector<32x128xf32> to vector<32x128xbf16>
    %cst_8 = arith.constant dense<0.000000e+00> : vector<32x128xf32>
    %11 = tpu.matmul %9, %10, %cst_8 {dimension_numbers = #tpu.dot_dimension_numbers<[1], [0], [0], [1], [0, 0, 1, 1], [], []>} : vector<32x32xbf16>, vector<32x128xbf16>, vector<32x128xf32> -> vector<32x128xf32>
    %c0_9 = arith.constant 0 : index
    %c0_10 = arith.constant 0 : index
    %c0_11 = arith.constant 0 : index
    %12 = vector.load %arg5[%c0_9, %c0_10, %c0_11] : memref<1x32x1xf32, #tpu.memory_space<vmem>>, vector<1x32x1xf32>
    %13 = vector.shape_cast %12 : vector<1x32x1xf32> to vector<32x1xf32>
    %14 = vector.broadcast %13 : vector<32x1xf32> to vector<32x128xf32>
    %15 = arith.addf %11, %14 : vector<32x128xf32>
    %16 = math.tanh %15 : vector<32x128xf32>
    %c0_12 = arith.constant 0 : index
    %c0_13 = arith.constant 0 : index
    %17 = vector.load %arg6[%c0_12, %c0_13] : memref<8x32xbf16, #tpu.memory_space<vmem>>, vector<8x32xbf16>
    %c0_14 = arith.constant 0 : index
    %c0_15 = arith.constant 0 : index
    %18 = vector.load %arg7[%c0_14, %c0_15] : memref<8x1xf32, #tpu.memory_space<vmem>>, vector<8x1xf32>
    %19 = arith.truncf %16 : vector<32x128xf32> to vector<32x128xbf16>
    %cst_16 = arith.constant dense<0.000000e+00> : vector<8x128xf32>
    %20 = tpu.matmul %17, %19, %cst_16 {dimension_numbers = #tpu.dot_dimension_numbers<[1], [0], [0], [1], [0, 0, 1, 1], [], []>} : vector<8x32xbf16>, vector<32x128xbf16>, vector<8x128xf32> -> vector<8x128xf32>
    %21 = vector.broadcast %18 : vector<8x1xf32> to vector<8x128xf32>
    %22 = arith.addf %20, %21 : vector<8x128xf32>
    %cst_17 = arith.constant 2.000000e+01 : f32
    %23 = vector.broadcast %cst_17 : f32 to vector<8x128xf32>
    %24 = arith.cmpf ogt, %22, %23 : vector<8x128xf32>
    %cst_18 = arith.constant 0.000000e+00 : f32
    %25 = vector.broadcast %cst_18 : f32 to vector<8x128xf32>
    %26 = arith.select %24, %25, %22 : vector<8x128xi1>, vector<8x128xf32>
    %cst_19 = arith.constant 2.000000e+01 : f32
    %27 = vector.broadcast %cst_19 : f32 to vector<8x128xf32>
    %28 = arith.cmpf ogt, %22, %27 : vector<8x128xf32>
    %29 = math.exp %26 : vector<8x128xf32>
    %30 = math.log1p %29 : vector<8x128xf32>
    %31 = arith.select %28, %22, %30 : vector<8x128xi1>, vector<8x128xf32>
    %32 = tpu.iota {dimensions = array<i32: 0>} : vector<8x128xi32>
    %c4_i32 = arith.constant 4 : i32
    %33 = vector.broadcast %c4_i32 : i32 to vector<8x128xi32>
    %34 = arith.cmpi sge, %32, %33 : vector<8x128xi32>
    %35 = arith.select %34, %31, %22 : vector<8x128xi1>, vector<8x128xf32>
    %c0_20 = arith.constant 0 : index
    %c0_21 = arith.constant 0 : index
    %36 = vector.load %arg8[%c0_20, %c0_21] : memref<8x128xf32, #tpu.memory_space<vmem>>, vector<8x128xf32>
    tpu.vector_store %arg8[%c0_20, %c0_21], %35 {strides = array<i32>} : memref<8x128xf32, #tpu.memory_space<vmem>>, vector<8x128xf32>,
    return
  }
  func.func @transform_0(%arg0: i32) -> (i32, i32) {
    %c0_i32 = arith.constant 0 : i32
    %c0_i32_0 = arith.constant 0 : i32
    return %c0_i32, %arg0 : i32, i32
  }
  func.func @transform_1(%arg0: i32) -> (i32, i32) {
    %c0_i32 = arith.constant 0 : i32
    %c0_i32_0 = arith.constant 0 : i32
    %c0_i32_1 = arith.constant 0 : i32
    return %c0_i32, %c0_i32_0 : i32, i32
  }
  func.func @transform_2(%arg0: i32) -> (i32, i32) {
    %c0_i32 = arith.constant 0 : i32
    %c0_i32_0 = arith.constant 0 : i32
    %c0_i32_1 = arith.constant 0 : i32
    return %c0_i32, %c0_i32_0 : i32, i32
  }
  func.func @transform_3(%arg0: i32) -> (i32, i32, i32) {
    %c0_i32 = arith.constant 0 : i32
    %c0_i32_0 = arith.constant 0 : i32
    %c0_i32_1 = arith.constant 0 : i32
    %c0_i32_2 = arith.constant 0 : i32
    return %c0_i32, %c0_i32_0, %c0_i32_1 : i32, i32, i32
  }
  func.func @transform_4(%arg0: i32) -> (i32, i32, i32) {
    %c0_i32 = arith.constant 0 : i32
    %c0_i32_0 = arith.constant 0 : i32
    %c0_i32_1 = arith.constant 0 : i32
    %c0_i32_2 = arith.constant 0 : i32
    return %c0_i32, %c0_i32_0, %c0_i32_1 : i32, i32, i32
  }
  func.func @transform_5(%arg0: i32) -> (i32, i32) {
    %c0_i32 = arith.constant 0 : i32
    %c0_i32_0 = arith.constant 0 : i32
    %c0_i32_1 = arith.constant 0 : i32
    return %c0_i32, %c0_i32_0 : i32, i32
  }
  func.func @transform_6(%arg0: i32) -> (i32, i32) {
    %c0_i32 = arith.constant 0 : i32
    %c0_i32_0 = arith.constant 0 : i32
    %c0_i32_1 = arith.constant 0 : i32
    return %c0_i32, %c0_i32_0 : i32, i32
  }
  func.func @transform_7(%arg0: i32) -> (i32, i32) {
    %c0_i32 = arith.constant 0 : i32
    %c0_i32_0 = arith.constant 0 : i32
    return %c0_i32, %arg0 : i32, i32
  }
}

</mosaic_0001>

<bundles_post_ra>
// kernel: ffn_params_normal_forward.1
= control target key start
LH: loop header
LB: loop body
LE: loop exit
PB: predicated region body
PF: predicated region fallthrough
CT: control target
= control target key end

     0   :  { %vm74_vm0 = vcmask 1043456   ;;  %v270_v1 = vmov 0   ;;  %vm67_vm1 = vcmask 64512   ;;  %vm141_vm2 = vcmask 261120   ;;  %s364_s0 = inlined_call_operand.vmem [shape: f32[8,8], index: 0, kind: input, shape index: {}]   ;;  %s365_s2 = inlined_call_operand.vmem [shape: f32[32,1], index: 2, kind: input, shape index: {}]   ;;  %s366_s1 = inlined_call_operand.vmem [shape: bf16[32,8], index: 1, kind: input, shape index: {}]   ;;  %s367_s4 = inlined_call_operand.vmem [shape: f32[1,32,1], index: 4, kind: input, shape index: {}]   ;;  %s368_s6 = inlined_call_operand.vmem [shape: f32[8,1], index: 6, kind: input, shape index: {}]   ;;  %s369_s3 = inlined_call_operand.vmem [shape: bf16[1,32,32], index: 3, kind: input, shape index: {}]   ;;  %s370_s5 = inlined_call_operand.vmem [shape: bf16[8,32], index: 5, kind: input, shape index: {}]   ;;  %s371_s7 = inlined_call_operand.vmem [shape: f32[8,8], index: 7, kind: output, shape index: {}]  }
   0x1   :  { %v27_v0 = vld [vmem:[%s364_s0] sm:$0xff]  ;;  %248 = vset.pattern.permute.xlu1 %v270_v1  ;;  %247 = vset.pattern.permute.xlu0 %v270_v1  ;;  %v34_v2 = vld [vmem:[%s365_s2 + $0x10] sm:$0xff]  ;;  %v35_v7 = vld [vmem:[%s365_s2 + $0x18] sm:$0xff]  ;;  %v210_v63 = vlaneseq }
   0x2   :  { %v36_v3 = vpack.c.bf16 %v27_v0, %v27_v0  ;;  %49 = vperm.xlu0 %247, %v34_v2   ;;  %v32_v4 = vld [vmem:[%s365_s2] sm:$0xff]  ;;  %249 = vset.pattern.permute.xlu2 %v270_v1  ;;  %v33_v8 = vld [vmem:[%s365_s2 + $0x8] sm:$0xff]  ;;  %v109_v14 = vld [vmem:[%s367_s4 + $0x10] sm:$0xff] }
   0x3   :  { %39 = vperm.xlu1 %248, %v32_v4   ;;  %v240_v6 = vld [vmem:[%s366_s1] sm:$0xff]  ;;  %v108_v10 = vld [vmem:[%s367_s4 + $0x8] sm:$0xff]  ;;  %123 = vperm.xlu2 %249, %v109_v14   ;;  %v110_v18 = vld [vmem:[%s367_s4 + $0x18] sm:$0xff]  ;;  %v211_v2 = vshrl.u32 %v210_v63, 7 }
   0x4   :  { %v76_v5 = vsel %vm74_vm0, %v36_v3, 0  ;;  %v107_v9 = vld [vmem:[%s367_s4] sm:$0xff]  ;;  %v241_v11 = vld [vmem:[%s366_s1 + $0x8] sm:$0xff] }
   0x5   :  { %85 = vmatpush.bf16.msra.mxu0 %v76_v5  ;;  %v172_v25 = vld [vmem:[%s368_s6] sm:$0xff]  ;;  %v243_v34 = vld [vmem:[%s369_s3 + $0x8] sm:$0xff]  ;;  %vm212_vm5 = vcmp.ge.s32.totalorder %v211_v2, 4 }
   0x6   :  { %v242_v33 = vld [vmem:[%s369_s3] sm:$0xff] }
   0x7   :  { %v171_v53 = vld [vmem:[%s370_s5] sm:$0xf] }
   0x8   :  { %227 = vmatmul.msk.bf16.vlgmr.msra.gmra.mxu0 %vm67_vm1, %v240_v6 }
   0xa   :  { %54 = vperm.xlu0 %247, %v35_v7  }
   0xb   :  { %44 = vperm.xlu1 %248, %v33_v8   ;;  %128 = vperm.xlu2 %249, %v110_v18  }
  0x12   :  { %113 = vperm.xlu0 %247, %v107_v9  }
  0x13   :  { %118 = vperm.xlu1 %248, %v108_v10   ;;  %177 = vperm.xlu2 %249, %v172_v25  }
  0x18   :  { %228 = vmatmul.msk.bf16.gmra.mxu0 %vm67_vm1, %v241_v11 }
  0x5d   :  { %v124_v36 = vpop.permute.xlu2 %123 }
  0x65   :  { %v129_v41 = vpop.permute.xlu2 %128 }
  0x6d   :  { %v178_v54 = vpop.permute.xlu2 %177 }
  0x74   :  { %v50_v16 = vpop.permute.xlu0 %49 }
  0x75   :  { %v40_v15 = vpop.permute.xlu1 %39 }
  0x7c   :  { %v55_v21 = vpop.permute.xlu0 %54 }
  0x7d   :  { %v45_v19 = vpop.permute.xlu1 %44 }
  0x84   :  { %v114_v45 = vpop.permute.xlu0 %113 }
  0x85   :  { %v87_v12 = vpop.f32.mrf.mxu0  ;;  %v119_v40 = vpop.permute.xlu1 %118 }
  0x86   :  { %v88_v26 = vadd.f32 %v87_v12, %v40_v15 }
  0x8d   :  { %v89_v13 = vpop.f32.mrf.mxu0 }
  0x8e   :  { %v90_v23 = vadd.f32 %v89_v13, %v45_v19 }
  0x95   :  { %v92_v17 = vpop.f32.mrf.mxu0 }
  0x96   :  { %v93_v20 = vadd.f32 %v92_v17, %v50_v16 }
  0x98   :  { %250 = vtanh.f32 %v93_v20 }
  0x9d   :  { %v94_v22 = vpop.f32.mrf.mxu0 }
  0x9e   :  { %v95_v24 = vadd.f32 %v94_v22, %v55_v21  ;;  %v251_v27 = vpop.eup %250 }
  0xa0   :  { %252 = vtanh.f32 %v95_v24 }
  0xa1   :  { %254 = vtanh.f32 %v90_v23 }
  0xa2   :  { %256 = vtanh.f32 %v88_v26 }
  0xa6   :  { %v253_v28 = vpop.eup %252 }
  0xa7   :  { %v106_v29 = vpack.c.bf16 %v253_v28, %v251_v27  ;;  %v255_v30 = vpop.eup %254 }
  0xa8   :  { %v257_v31 = vpop.eup %256 }
  0xa9   :  { %154 = vmatpush.bf16.msra.mxu1 %v106_v29  ;;  %244 = vmatpush.bf16.msra.mxu3 %v106_v29  ;;  %v105_v32 = vpack.c.bf16 %v255_v30, %v257_v31 }
  0xad   :  { %155 = vmatpush.bf16.msra.mxu1 %v105_v32  ;;  %245 = vmatpush.bf16.msra.mxu3 %v105_v32 }
  0xb0   :  { %237 = vmatmul.msk.bf16.vlgmr.msra.gmra.mxu1 %vm141_vm2, %v242_v33  ;;  %238 = vmatmul.msk.bf16.vlgmr.msra.gmra.mxu3 %vm141_vm2, %v243_v34 }
 0x12d   :  { %v157_v35 = vpop.f32.mrf.mxu1 }
 0x12e   :  { %v158_v46 = vadd.f32 %v157_v35, %v114_v45 }
 0x133   :  { %v162_v37 = vpop.f32.mrf.mxu3 }
 0x134   :  { %v163_v38 = vadd.f32 %v162_v37, %v124_v36 }
 0x135   :  { %v159_v39 = vpop.f32.mrf.mxu1 }
 0x136   :  { %v160_v43 = vadd.f32 %v159_v39, %v119_v40  ;;  %258 = vtanh.f32 %v163_v38 }
 0x13b   :  { %v164_v42 = vpop.f32.mrf.mxu3 }
 0x13c   :  { %v165_v44 = vadd.f32 %v164_v42, %v129_v41  ;;  %v259_v47 = vpop.eup %258 }
 0x13e   :  { %260 = vtanh.f32 %v165_v44 }
 0x13f   :  { %262 = vtanh.f32 %v160_v43 }
 0x140   :  { %264 = vtanh.f32 %v158_v46 }
 0x144   :  { %v261_v48 = vpop.eup %260 }
 0x145   :  { %v174_v49 = vpack.c.bf16 %v261_v48, %v259_v47  ;;  %v263_v50 = vpop.eup %262 }
 0x146   :  { %v265_v51 = vpop.eup %264 }
 0x147   :  { %189 = vmatpush.bf16.msra.mxu2 %v174_v49  ;;  %v173_v52 = vpack.c.bf16 %v263_v50, %v265_v51 }
 0x14b   :  { %190 = vmatpush.bf16.msra.mxu2 %v173_v52 }
 0x14e   :  { %239 = vmatmul.msk.bf16.vlgmr.msra.gmra.mxu2 %vm141_vm2, %v171_v53 }
 0x1d1   :  { %v192_v55 = vpop.f32.mrf.mxu2 }
 0x1d2   :  { %v193_v56 = vadd.f32 %v192_v55, %v178_v54 }
 0x1d4   :  { %vm196_vm3 = vcmp.gt.f32.partialorder %v193_v56, 20.0 }
 0x1d5   :  { %v197_v57 = vsel %vm196_vm3, 0.0, %v193_v56 }
 0x1d6   :  { %v198_v58 = vmul.f32 1.442695, %v197_v57 }
 0x1d8   :  { %266 = vpow2.f32 %v198_v58 }
 0x1d9   :  { %v194_v59 = vpop.f32.mrf.mxu2 }
 0x1de   :  { %v267_v60 = vpop.eup %266 }
 0x1df   :  { %v200_v61 = vadd.f32 1.0, %v267_v60  ;;  %v203_v62 = vmul.f32 -0.5, %v267_v60  ;;  %v206_v1 = vand.u32 2147483647, %v267_v60 }
 0x1e1   :  { %268 = vlog2.f32 %v200_v61  ;;  %v204_v0 = vadd.f32 1.0, %v203_v62  ;;  %vm207_vm4 = vcmp.lt.f32.partialorder %v206_v1, 0.0004427343 }
 0x1e3   :  { %v205_v5 = vmul.f32 %v267_v60, %v204_v0 }
 0x1e7   :  { %v269_v3 = vpop.eup %268 }
 0x1e8   :  { %v202_v4 = vmul.f32 0.6931472, %v269_v3 }
 0x1ea   :  { %v208_v6 = vsel %vm207_vm4, %v205_v5, %v202_v4 }
 0x1eb   :  { %v209_v7 = vsel %vm196_vm3, %v193_v56, %v208_v6 }
 0x1ec   :  { %v213_v8 = vsel %vm212_vm5, %v209_v7, %v193_v56 }
 0x1ed   :  { %214 = vst [vmem:[%s371_s7] sm:$0xff] %v213_v8 }

</bundles_post_ra>
